<compile_context>
chip_gen: v7x
topology: tpu7x:2x2x1
jax: 0.10.0
libtpu: 0.0.40
codegen_flags: <defaults>
</compile_context>

<pallas_src>
import jax
import jax.numpy as jnp
from jax.experimental import pallas as pl
from jax.experimental.pallas import tpu as pltpu

LANE = 128
SUB = 8


def _round_up(x, m):
    return (x + m - 1) // m * m


def _ce_kernel(p_ref, t_ref, out_ref):
    # p_ref:   (1, C, TR, LANE) logits
    # t_ref:   (1, TR, LANE)    int32 class ids (-1 = padding)
    # out_ref: (1, 1, SUB, LANE) partial CE sums for this (batch, spatial tile)
    _, C, TR, L = p_ref.shape
    p = p_ref[...].reshape(C, TR, L).astype(jnp.float32)
    t = t_ref[...].reshape(TR, L)

    # Stable log-sum-exp over the (small, leading) channel axis: VPU max/add + EUP exp/log.
    m = jnp.max(p, axis=0)                                    # (TR, L)
    lse = m + jnp.log(jnp.sum(jnp.exp(p - m), axis=0))        # (TR, L)

    # Logit of the target class via compare/select (statically unrolled over C).
    tgt = jnp.zeros((TR, L), jnp.float32)
    for c in range(C):
        tgt = tgt + jnp.where(t == c, p[c], 0.0)

    valid = t >= 0                                            # padded lanes carry -1
    ce = jnp.where(valid, lse - tgt, 0.0)                     # (TR, L)

    # Fold rows into one (8, 128) slab with elementwise adds; the final
    # cross-lane reduction happens once, outside the kernel.
    out_ref[...] = ce.reshape(TR // SUB, SUB, L).sum(axis=0).reshape(1, 1, SUB, L)


def cross_entropy_loss(y_pred, y_true):
    """y_pred: (N, C, H, W) logits (f32 or bf16).  y_true: (N, H, W) int class ids."""
    N, C, H, W = y_pred.shape
    S = H * W

    # ---- spatial tiling: rows of 128 lanes, tile rows capped for VMEM ----
    s_rows = pl.cdiv(S, LANE)
    bytes_per_row = C * LANE * 4                       # f32 logits row across channels
    tr_cap = max(SUB, ((8 * 1024 * 1024) // (2 * bytes_per_row)) // SUB * SUB)
    tr = min(512, tr_cap, _round_up(s_rows, SUB))      # multiple of 8
    s_rows_pad = _round_up(s_rows, tr)
    s_pad = s_rows_pad * LANE
    n_tiles = s_rows_pad // tr

    p = y_pred.reshape(N, C, S)
    t = y_true.astype(jnp.int32).reshape(N, S)
    if s_pad != S:
        p = jnp.pad(p, ((0, 0), (0, 0), (0, s_pad - S)))
        t = jnp.pad(t, ((0, 0), (0, s_pad - S)), constant_values=-1)
    p = p.reshape(N, C, s_rows_pad, LANE)
    t = t.reshape(N, s_rows_pad, LANE)

    partials = pl.pallas_call(
        _ce_kernel,
        out_shape=jax.ShapeDtypeStruct((N, n_tiles, SUB, LANE), jnp.float32),
        grid_spec=pltpu.PrefetchScalarGridSpec(
            num_scalar_prefetch=0,
            grid=(N, n_tiles),
            in_specs=[
                pl.BlockSpec((1, C, tr, LANE), lambda n, s: (n, 0, s, 0)),
                pl.BlockSpec((1, tr, LANE), lambda n, s: (n, s, 0)),
            ],
            out_specs=pl.BlockSpec((1, 1, SUB, LANE), lambda n, s: (n, s, 0, 0)),
        ),
        compiler_params=pltpu.CompilerParams(
            dimension_semantics=("parallel", "parallel")),
    )(p, t)

    # Mean over all N*H*W positions (nn.CrossEntropyLoss default reduction).
    return jnp.sum(partials) / (N * S)


def _reference(y_pred, y_true):
    """Pure-JAX reference matching torch.nn.CrossEntropyLoss (index targets, mean)."""
    logp = jax.nn.log_softmax(y_pred.astype(jnp.float32), axis=1)
    onehot = jax.nn.one_hot(y_true, y_pred.shape[1], axis=1, dtype=jnp.float32)
    return jnp.mean(-jnp.sum(onehot * logp, axis=1))


if __name__ == "__main__":
    key = jax.random.PRNGKey(0)
    k_pred, k_cls = jax.random.split(key)

    N, C, H, W = 2, 4, 16, 16
    y_pred = jax.random.normal(k_pred, (N, C, H, W), dtype=jnp.float32)
    y_true = jax.random.randint(k_cls, (N, H, W), 0, C, dtype=jnp.int32)

    loss = jax.block_until_ready(cross_entropy_loss(y_pred, y_true))
    ref = jax.block_until_ready(_reference(y_pred, y_true))

    assert jnp.allclose(loss, ref, rtol=1e-5, atol=1e-5), (loss, ref)
    print("KERNEL_OK")
</pallas_src>

<mosaic_0001>
module attributes {stable_mosaic.version = 11 : i64} {
  func.func @_ce_kernel(%arg0: i32, %arg1: i32, %arg2: memref<1x4x8x128xf32, #tpu.memory_space<vmem>>, %arg3: memref<1x8x128xi32, #tpu.memory_space<vmem>>, %arg4: memref<1x1x8x128xf32, #tpu.memory_space<vmem>>) attributes {dimension_semantics = [#tpu.dimension_semantics<parallel>, #tpu.dimension_semantics<parallel>], iteration_bounds = array<i64: 2, 1>, scalar_prefetch = 0 : i64, scratch_operands = 0 : i64, tpu.core_type = #tpu.core_type<tc>, window_params = [{transform_indices = @transform_0, window_bounds = array<i64: 1, 4, 8, 128>}, {transform_indices = @transform_1, window_bounds = array<i64: 1, 8, 128>}, {transform_indices = @transform_2, window_bounds = array<i64: 1, 1, 8, 128>}]} {
    %c0 = arith.constant 0 : index
    %c0_0 = arith.constant 0 : index
    %c0_1 = arith.constant 0 : index
    %c0_2 = arith.constant 0 : index
    %0 = vector.load %arg2[%c0, %c0_0, %c0_1, %c0_2] : memref<1x4x8x128xf32, #tpu.memory_space<vmem>>, vector<1x4x8x128xf32>
    %1 = vector.shape_cast %0 : vector<1x4x8x128xf32> to vector<4x8x128xf32>
    %c0_3 = arith.constant 0 : index
    %c0_4 = arith.constant 0 : index
    %c0_5 = arith.constant 0 : index
    %2 = vector.load %arg3[%c0_3, %c0_4, %c0_5] : memref<1x8x128xi32, #tpu.memory_space<vmem>>, vector<1x8x128xi32>
    %3 = vector.shape_cast %2 : vector<1x8x128xi32> to vector<8x128xi32>
    %cst = arith.constant dense<0xFF800000> : vector<8x128xf32>
    %4 = vector.multi_reduction <maximumf>, %1, %cst [0] : vector<4x8x128xf32> to vector<8x128xf32>
    %5 = vector.shape_cast %4 : vector<8x128xf32> to vector<1x8x128xf32>
    %6 = vector.broadcast %5 : vector<1x8x128xf32> to vector<4x8x128xf32>
    %7 = arith.subf %1, %6 : vector<4x8x128xf32>
    %8 = math.exp %7 : vector<4x8x128xf32>
    %cst_6 = arith.constant dense<0.000000e+00> : vector<8x128xf32>
    %9 = vector.multi_reduction <add>, %8, %cst_6 [0] : vector<4x8x128xf32> to vector<8x128xf32>
    %10 = math.log %9 : vector<8x128xf32>
    %11 = arith.addf %4, %10 : vector<8x128xf32>
    %cst_7 = arith.constant 0.000000e+00 : f32
    %12 = vector.broadcast %cst_7 : f32 to vector<8x128xf32>
    %c0_i32 = arith.constant 0 : i32
    %13 = vector.broadcast %c0_i32 : i32 to vector<8x128xi32>
    %14 = arith.cmpi eq, %3, %13 : vector<8x128xi32>
    %15 = vector.extract_strided_slice %1 {offsets = [0, 0, 0], sizes = [1, 8, 128], strides = [1, 1, 1]} : vector<4x8x128xf32> to vector<1x8x128xf32>
    %16 = vector.shape_cast %15 : vector<1x8x128xf32> to vector<8x128xf32>
    %cst_8 = arith.constant 0.000000e+00 : f32
    %17 = vector.broadcast %cst_8 : f32 to vector<8x128xf32>
    %18 = arith.select %14, %16, %17 : vector<8x128xi1>, vector<8x128xf32>
    %19 = arith.addf %12, %18 : vector<8x128xf32>
    %c1_i32 = arith.constant 1 : i32
    %20 = vector.broadcast %c1_i32 : i32 to vector<8x128xi32>
    %21 = arith.cmpi eq, %3, %20 : vector<8x128xi32>
    %22 = vector.extract_strided_slice %1 {offsets = [1, 0, 0], sizes = [1, 8, 128], strides = [1, 1, 1]} : vector<4x8x128xf32> to vector<1x8x128xf32>
    %23 = vector.shape_cast %22 : vector<1x8x128xf32> to vector<8x128xf32>
    %cst_9 = arith.constant 0.000000e+00 : f32
    %24 = vector.broadcast %cst_9 : f32 to vector<8x128xf32>
    %25 = arith.select %21, %23, %24 : vector<8x128xi1>, vector<8x128xf32>
    %26 = arith.addf %19, %25 : vector<8x128xf32>
    %c2_i32 = arith.constant 2 : i32
    %27 = vector.broadcast %c2_i32 : i32 to vector<8x128xi32>
    %28 = arith.cmpi eq, %3, %27 : vector<8x128xi32>
    %29 = vector.extract_strided_slice %1 {offsets = [2, 0, 0], sizes = [1, 8, 128], strides = [1, 1, 1]} : vector<4x8x128xf32> to vector<1x8x128xf32>
    %30 = vector.shape_cast %29 : vector<1x8x128xf32> to vector<8x128xf32>
    %cst_10 = arith.constant 0.000000e+00 : f32
    %31 = vector.broadcast %cst_10 : f32 to vector<8x128xf32>
    %32 = arith.select %28, %30, %31 : vector<8x128xi1>, vector<8x128xf32>
    %33 = arith.addf %26, %32 : vector<8x128xf32>
    %c3_i32 = arith.constant 3 : i32
    %34 = vector.broadcast %c3_i32 : i32 to vector<8x128xi32>
    %35 = arith.cmpi eq, %3, %34 : vector<8x128xi32>
    %36 = vector.extract_strided_slice %1 {offsets = [3, 0, 0], sizes = [1, 8, 128], strides = [1, 1, 1]} : vector<4x8x128xf32> to vector<1x8x128xf32>
    %37 = vector.shape_cast %36 : vector<1x8x128xf32> to vector<8x128xf32>
    %cst_11 = arith.constant 0.000000e+00 : f32
    %38 = vector.broadcast %cst_11 : f32 to vector<8x128xf32>
    %39 = arith.select %35, %37, %38 : vector<8x128xi1>, vector<8x128xf32>
    %40 = arith.addf %33, %39 : vector<8x128xf32>
    %c0_i32_12 = arith.constant 0 : i32
    %41 = vector.broadcast %c0_i32_12 : i32 to vector<8x128xi32>
    %42 = arith.cmpi sge, %3, %41 : vector<8x128xi32>
    %43 = arith.subf %11, %40 : vector<8x128xf32>
    %cst_13 = arith.constant 0.000000e+00 : f32
    %44 = vector.broadcast %cst_13 : f32 to vector<8x128xf32>
    %45 = arith.select %42, %43, %44 : vector<8x128xi1>, vector<8x128xf32>
    %46 = vector.shape_cast %45 : vector<8x128xf32> to vector<1x8x128xf32>
    %cst_14 = arith.constant dense<0.000000e+00> : vector<8x128xf32>
    %47 = vector.multi_reduction <add>, %46, %cst_14 [0] : vector<1x8x128xf32> to vector<8x128xf32>
    %48 = vector.shape_cast %47 : vector<8x128xf32> to vector<1x1x8x128xf32>
    %c0_15 = arith.constant 0 : index
    %c0_16 = arith.constant 0 : index
    %c0_17 = arith.constant 0 : index
    %c0_18 = arith.constant 0 : index
    %49 = vector.load %arg4[%c0_15, %c0_16, %c0_17, %c0_18] : memref<1x1x8x128xf32, #tpu.memory_space<vmem>>, vector<1x1x8x128xf32>
    tpu.vector_store %arg4[%c0_15, %c0_16, %c0_17, %c0_18], %48 {strides = array<i32>} : memref<1x1x8x128xf32, #tpu.memory_space<vmem>>, vector<1x1x8x128xf32>,
    return
  }
  func.func @transform_0(%arg0: i32, %arg1: i32) -> (i32, i32, i32, i32) {
    %c0_i32 = arith.constant 0 : i32
    %c0_i32_0 = arith.constant 0 : i32
    %c0_i32_1 = arith.constant 0 : i32
    return %arg0, %c0_i32, %arg1, %c0_i32_0 : i32, i32, i32, i32
  }
  func.func @transform_1(%arg0: i32, %arg1: i32) -> (i32, i32, i32) {
    %c0_i32 = arith.constant 0 : i32
    %c0_i32_0 = arith.constant 0 : i32
    return %arg0, %arg1, %c0_i32 : i32, i32, i32
  }
  func.func @transform_2(%arg0: i32, %arg1: i32) -> (i32, i32, i32, i32) {
    %c0_i32 = arith.constant 0 : i32
    %c0_i32_0 = arith.constant 0 : i32
    %c0_i32_1 = arith.constant 0 : i32
    return %arg0, %arg1, %c0_i32, %c0_i32_0 : i32, i32, i32, i32
  }
}

</mosaic_0001>

<bundles_post_ra>
// kernel: tpu_custom_call.1
= control target key start
LH: loop header
LB: loop body
LE: loop exit
PB: predicated region body
PF: predicated region fallthrough
CT: control target
= control target key end

     0   :  { %7 = vsyncpa [#allocation3], 0  ;;  %s866_s0 = inlined_call_operand.hbm [shape: f32[2,4,8,128], index: 0, kind: input, shape index: {}]   ;;  %s867_s1 = inlined_call_operand.hbm [shape: s32[2,8,128], index: 1, kind: input, shape index: {}]   ;;  %s868_s2 = inlined_call_operand.hbm [shape: f32[2,1,8,128], index: 2, kind: output, shape index: {}]  }
   0x1   :  { %9 = vsyncpa [#allocation3 + $0x1], 0 }
   0x2   :  { %10 = vsyncpa [#allocation6], 0 }
   0x3   :  { %12 = vsyncpa [#allocation6 + $0x1], 0 }
   0x4   :  { %13 = vsyncpa [#allocation4], 0 }
   0x5   :  { %15 = vsyncpa [#allocation4 + $0x1], 0  ;;  %s647_s9 = smov 0   ;;  %s649_s10 = smov 0  }
   0x6   :  { %s651_s11 = smov 0   ;;  %s653_s12 = smov 0  }
   0x7   :  { %s655_s13 = smov 0   ;;  %s657_s14 = smov 0  }
   0x8 LB: > { %s382_s15 = sadd.s32 4294967295, %s625_s14   ;;  %s383_s16 = sadd.s32 4294967294, %s625_s14   ;;  %s625_s14 = sphi %s657_s14, %s21_s14   ;;  %s621_s13 = sphi %s655_s13, %s887_s13   ;;  %s617_s12 = sphi %s653_s12, %s886_s12   ;;  %s613_s11 = sphi %s651_s11, %s885_s11   ;;  %s609_s10 = sphi %s649_s10, %s884_s10   ;;  %s605_s9 = sphi %s647_s9, %s883_s9  }
   0x9   : > { %s33_s17 = sadd.s32 1, %s621_s13  ;;  %s42_s18 = sadd.s32 1, %s613_s11 }
   0xa   : > { %p35_p0 = scmp.ge.s32.totalorder %s33_s17, 2  ;;  %p49_p1 = scmp.ne.s32.totalorder %s613_s11, %s609_s10 }
   0xb   : > { %p50_p2 = scmp.eq.s32.totalorder %s625_s14, 0  ;;  %p55_p3 = scmp.ne.s32.totalorder %s609_s10, %s605_s9 }
   0xc   : > { %s889_s17 = smov (%p35_p0, %s33_s17), 0  ;;  %p56_p5 = scmp.eq.s32.totalorder %s382_s15, 0 }
   0xd   : > { %p688_p4 = por %p50_p2, %p49_p1  ;;  %s37_s20 = ssub.s32 %s621_s13, %s889_s17 }
   0xe   : > { %p109_p6 = scmp.eq.s32.totalorder %s382_s15, 1  ;;  %p40_p7 = scmp.eq.s32.totalorder %s37_s20, 0 }
   0xf   : > { %p694_p8 = por %p56_p5, %p55_p3  ;;  %p115_p10 = scmp.eq.s32.totalorder %s383_s16, 1 }
  0x10   : > { %p698_p9 = por %p109_p6, %p49_p1  ;;  %p417_p13 = scmp.lt.s32.totalorder %s625_s14, 2 }
  0x11   : > { %s872_s21 = scalar_select %p694_p8, 1, 0 }
  0x12   : > { %s873_s22 = scalar_select %p698_p9, 1, 0 }
  0x13   : > { %s703_s23 = scalar_select %p40_p7, %s613_s11, %s42_s18  }
  0x14   : > { %p705_p11 = por %p115_p10, %p55_p3  ;;  %s712_s25 = sand.u32 1, %s613_s11  }
  0x15   : > { %s386_s26 = sshll.u32 %s712_s25, 5  ;;  %s399_s27 = sshll.u32 %s621_s13, 9 }
  0x16   : > { %s874_s24 = scalar_select %p705_p11, 1, 0 }
  0x17   : > { %s719_s30 = scalar_lea.hbm %s866_s0, %s399_s27  ;;  %s139_s3 = scalar_lea.vmem [#allocation2], %s386_s26 }
  0x18   : > { %s147_s4 = sshll.u32 %s139_s3, 4  ;;  %p725_p0 = pnand %p417_p13, %p688_p4  ;;  %s721_s4 = int_to_ptr.vmem [resolvable:$true] %s147_s4 }
  0x19   : > { %s136_s6 = scalar_lea.sflag [#allocation3], %s712_s25  ;;  %s479_s7 = scalar_lea.hbm %s719_s30, 512 }
  0x1a   : > { %p480_p2 = scmp.ne.s32.totalorder %s719_s30, %s479_s7  ;;  %p481_p3 = pneg %p725_p0 }
  0x1b   : > { %s484_s16 = scalar_lea.hbm %s866_s0, 1024  ;;  %p485_p4 = scmp.lt.u32.totalorder %s719_s30, %s866_s0 }
  0x1c   : > { %p482_p5 = pnand %p481_p3, %p480_p2  ;;  %p486_p7 = scmp.lt.u32.totalorder %s484_s16, %s479_s7 }
  0x1d   : > { %p488_p13 = scmp.lt.u32.totalorder %s479_s7, %s719_s30 }
  0x1e   : > { %p483_p6 = pneg %p482_p5  ;;  %p487_p10 = por %p486_p7, %p485_p4 }
  0x20   : > { %p489_p12 = por %p488_p13, %p487_p10 }
  0x22   : > { %p490_p1 = pnand %p489_p12, %p483_p6 }
  0x24   : > { %493 = shalt.err (!%p490_p1)
}
  0x25   : > { %s494_s20 = scalar_lea.vmem %s721_s4, 512  ;;  %s627_s26 = smov [#allocation2]  }
  0x26   : > { %p495_p2 = scmp.ne.s32.totalorder %s721_s4, %s494_s20  ;;  %s499_s27 = sshll.u32 %s627_s26, 4  ;;  %s500_s27 = int_to_ptr.vmem [resolvable:$false] %s499_s27 }
  0x27   : > { %s501_s28 = scalar_lea.vmem %s500_s27, 1024  ;;  %p502_p9 = scmp.lt.s32.totalorder %s721_s4, %s500_s27 }
  0x28   : > { %p497_p5 = pnand %p495_p2, %p481_p3  ;;  %p503_p4 = scmp.lt.s32.totalorder %s501_s28, %s494_s20 }
  0x2a   : > { %p498_p11 = pneg %p497_p5  ;;  %p504_p7 = por %p503_p4, %p502_p9 }
  0x2c   : > { %p505_p10 = pnand %p504_p7, %p498_p11 }
  0x2e   : > { %508 = shalt.err (!%p505_p10)
}
  0x2f   : > { %s628_s29 = smov 128   ;;  %s629_s3 = smov 8  }
  0x30   : > { %409 = dma.hbm_to_vmem [thread:$0]  (!%p725_p0), %s719_s30, 512, %s721_s4, %s136_s6, %s628_s29, %s628_s29, %s629_s3  }
  0x31   : > { %p174_p12 = scmp.lt.s32.totalorder %s625_s14, 3  ;;  %s389_s7 = sshll.u32 %s712_s25, 3 }
  0x32   : > { %s390_s8 = sshll.u32 %s621_s13, 7  ;;  %p876_p9 = scmp.ge.s32.totalorder %s625_s14, 1 }
  0x33   : > { %s770_s19 = scalar_lea.hbm %s867_s1, %s390_s8  ;;  %s161_s20 = scalar_lea.vmem [#allocation5], %s389_s7 }
  0x34   : > { %p763_p11 = pnand %p876_p9, %p174_p12  ;;  %s169_s26 = sshll.u32 %s161_s20, 4  ;;  %s170_s26 = int_to_ptr.vmem [resolvable:$true] %s169_s26 }
  0x35   : > { %s158_s30 = scalar_lea.sflag [#allocation6], %s712_s25  ;;  %s509_s4 = scalar_lea.hbm %s770_s19, 128 }
  0x36   : > { %s877_s15 = scalar_select %p763_p11, 1, 0 }
  0x37   : > { %p510_p1 = scmp.ne.s32.totalorder %s770_s19, %s509_s4  ;;  %s514_s28 = scalar_lea.hbm %s867_s1, 256 }
  0x38   : > { %p515_p2 = scmp.lt.u32.totalorder %s770_s19, %s867_s1  ;;  %p516_p5 = scmp.lt.u32.totalorder %s514_s28, %s509_s4 }
  0x39   : > { %p512_p6 = pnand %p510_p1, %p481_p3  ;;  %p518_p7 = scmp.lt.u32.totalorder %s509_s4, %s770_s19 }
  0x3a   : > { %p517_p4 = por %p516_p5, %p515_p2 }
  0x3b   : > { %p513_p13 = pneg %p512_p6 }
  0x3c   : > { %p519_p10 = por %p518_p7, %p517_p4 }
  0x3e   : > { %p520_p12 = pnand %p519_p10, %p513_p13 }
  0x40   : > { %523 = shalt.err (!%p520_p12)
}
  0x41   : > { %s524_s25 = scalar_lea.vmem %s170_s26, 128  ;;  %s630_s7 = smov [#allocation5]  }
  0x42   : > { %p525_p9 = scmp.ne.s32.totalorder %s170_s26, %s524_s25  ;;  %s529_s8 = sshll.u32 %s630_s7, 4  ;;  %s530_s8 = int_to_ptr.vmem [resolvable:$false] %s529_s8 }
  0x43   : > { %s531_s16 = scalar_lea.vmem %s530_s8, 256  ;;  %p532_p8 = scmp.lt.s32.totalorder %s170_s26, %s530_s8 }
  0x44   : > { %p527_p1 = pnand %p525_p9, %p481_p3  ;;  %p533_p11 = scmp.lt.s32.totalorder %s531_s16, %s524_s25 }
  0x46   : > { %p528_p6 = pneg %p527_p1  ;;  %p534_p2 = por %p533_p11, %p532_p8 }
  0x48   : > { %p535_p5 = pnand %p534_p2, %p528_p6 }
  0x4a   : > { %538 = shalt.err (!%p535_p5)
}
  0x4b   : > { %412 = dma.hbm_to_vmem [thread:$0]  (!%p725_p0), %s770_s19, 128, %s170_s26, %s158_s30  }
  0x4c   : > { %p878_p13 = scmp.ne.s32.totalorder %s877_s15, 0 }
  0x4d   : > { %s795_s18 = sand.u32 (!%p878_p13), 1, %s609_s10   ;;  %p879_p3 = scmp.ne.s32.totalorder (!%p878_p13), %s872_s21, 0 }
  0x4e   : > { %178 = sbr.rel (%p878_p13) target bundleno = 149 (0x95), region = 28  ;;  %s392_s20 = sshll.u32 (!%p878_p13), %s795_s18, 5 }
  0x4f   : > { %s181_s4 = scalar_lea.sflag (!%p878_p13), [#allocation3], %s795_s18  ;;  %s184_s6 = scalar_lea.vmem (!%p878_p13), [#allocation2], %s392_s20 }
  0x55   : > { %592 = dma.done.wait (%p879_p3), %s181_s4, 512  }
  0x56   : > { %594 = vsyncadd (%p879_p3), %s181_s4, 4294966784  ;;  %s393_s5 = sshll.u32 %s795_s18, 3  ;;  %s190_s15 = scalar_lea.sflag [#allocation6], %s795_s18 }
  0x57   : > { %s193_s19 = scalar_lea.vmem [#allocation5], %s393_s5 }
  0x58   : > { %596 = dma.done.wait (%p879_p3), %s190_s15, 128  }
  0x59   : > { %598 = vsyncadd (%p879_p3), %s190_s15, 4294967168  ;;  %v219_v0 = vld [vmem:[%s184_s6] sm:$0xff]  ;;  %v220_v1 = vld [vmem:[%s184_s6 + $0x8] sm:$0xff]  ;;  %s218_s21 = scalar_lea.vmem [#allocation7], %s393_s5  ;;  %s396_s30 = sshll.u32 %s617_s12, 7 }
  0x5a   : > { %v221_v2 = vld [vmem:[%s184_s6 + $0x10] sm:$0xff]  ;;  %v222_v3 = vld [vmem:[%s184_s6 + $0x18] sm:$0xff]  ;;  %v224_v4 = vmax.f32 %v219_v0, %v220_v1  ;;  %v223_v18 = vld [vmem:[%s193_s19] sm:$0xff]  ;;  %s277_s26 = sshll.u32 %s218_s21, 4  ;;  %s819_s29 = scalar_lea.hbm %s868_s2, %s396_s30  ;;  %s814_s26 = int_to_ptr.vmem [resolvable:$true] %s277_s26 }
  0x5b   : > { %v225_v5 = vmax.f32 %v221_v2, %v222_v3  ;;  %vm245_vm0 = vcmp.eq.s32.totalorder %v223_v18, 0  ;;  %vm248_vm1 = vcmp.eq.s32.totalorder %v223_v18, 1  ;;  %vm251_vm2 = vcmp.eq.s32.totalorder %v223_v18, 2  ;;  %s263_s3 = scalar_lea.sflag [#allocation4], %s795_s18  ;;  %s539_s25 = scalar_lea.vmem %s814_s26, 128 }
  0x5c   : > { %v246_v23 = vsel %vm245_vm0, %v219_v0, 0.0  ;;  %v249_v24 = vsel %vm248_vm1, %v220_v1, 0.0  ;;  %v252_v26 = vsel %vm251_vm2, %v221_v2, 0.0  ;;  %vm254_vm3 = vcmp.eq.s32.totalorder %v223_v18, 3  ;;  %p540_p8 = scmp.ne.s32.totalorder %s814_s26, %s539_s25  ;;  %p880_p0 = scmp.ne.s32.totalorder %s873_s22, 0 }
  0x5d   : > { %v226_v6 = vmax.f32 %v224_v4, %v225_v5  ;;  %v250_v25 = vadd.f32 %v249_v24, %v246_v23  ;;  %v255_v28 = vsel %vm254_vm3, %v222_v3, 0.0  ;;  %vm257_vm4 = vcmp.ge.s32.totalorder %v223_v18, 0  ;;  %s631_s12 = smov [#allocation7]  }
  0x5e   : > { %p541_p11 = pnand %p540_p8, %p880_p0  ;;  %s543_s7 = sshll.u32 %s631_s12, 4  ;;  %s544_s7 = int_to_ptr.vmem [resolvable:$false] %s543_s7 }
  0x5f   : > { %v227_v7 = vsub.f32 %v219_v0, %v226_v6  ;;  %v228_v8 = vsub.f32 %v220_v1, %v226_v6  ;;  %v229_v9 = vsub.f32 %v221_v2, %v226_v6  ;;  %v230_v10 = vsub.f32 %v222_v3, %v226_v6  ;;  %s545_s8 = scalar_lea.vmem %s544_s7, 256  ;;  %p546_p7 = scmp.lt.s32.totalorder %s814_s26, %s544_s7 }
  0x60   : > { %v253_v27 = vadd.f32 %v252_v26, %v250_v25  ;;  %p542_p4 = pneg %p541_p11  ;;  %p547_p10 = scmp.lt.s32.totalorder %s545_s8, %s539_s25 }
  0x61   : > { %v231_v11 = vmul.f32 1.442695, %v227_v7  ;;  %v233_v12 = vmul.f32 1.442695, %v228_v8  ;;  %v235_v13 = vmul.f32 1.442695, %v229_v9 }
  0x62   : > { %v237_v14 = vmul.f32 1.442695, %v230_v10  ;;  %v256_v31 = vadd.f32 %v255_v28, %v253_v27  ;;  %p548_p12 = por %p547_p10, %p546_p7 }
  0x63   : > { %469 = vpow2.f32 %v231_v11 }
  0x64   : > { %471 = vpow2.f32 %v233_v12  ;;  %p549_p9 = pnand %p548_p12, %p542_p4 }
  0x65   : > { %473 = vpow2.f32 %v235_v13 }
  0x66   : > { %475 = vpow2.f32 %v237_v14 }
  0x6d   : > { %v470_v15 = vpop.eup %469 }
  0x6e   : > { %v472_v16 = vpop.eup %471 }
  0x6f   : > { %v474_v17 = vpop.eup %473  ;;  %v239_v19 = vadd.f32 %v472_v16, %v470_v15 }
  0x70   : > { %v476_v20 = vpop.eup %475 }
  0x71   : > { %v240_v21 = vadd.f32 %v474_v17, %v239_v19 }
  0x73   : > { %v241_v22 = vadd.f32 %v476_v20, %v240_v21 }
  0x75   : > { %477 = vlog2.f32 %v241_v22 }
  0x7f   : > { %v478_v29 = vpop.eup %477 }
  0x80   : > { %v243_v30 = vmul.f32 0.6931472, %v478_v29 }
  0x82   : > { %v244_v32 = vadd.f32 %v243_v30, %v226_v6 }
  0x84   : > { %v258_v33 = vsub.f32 %v244_v32, %v256_v31 }
  0x86   : > { %v259_v34 = vsel %vm257_vm4, %v258_v33, 0.0 }
  0x87   : > { %261 = vst [vmem:[%s218_s21] sm:$0xff] %v259_v34 }
  0x88   : > { %552 = shalt.err (!%p549_p9)
}
  0x89   : > { %s553_s16 = scalar_lea.hbm %s819_s29, 128  ;;  %s557_s4 = scalar_lea.hbm %s868_s2, 256 }
  0x8a   : > { %p554_p1 = scmp.ne.s32.totalorder %s819_s29, %s553_s16  ;;  %p558_p5 = scmp.lt.u32.totalorder %s819_s29, %s868_s2 }
  0x8b   : > { %p559_p13 = scmp.lt.u32.totalorder %s557_s4, %s553_s16  ;;  %p561_p8 = scmp.lt.u32.totalorder %s553_s16, %s819_s29 }
  0x8c   : > { %p555_p6 = pnand %p554_p1, %p880_p0 }
  0x8d   : > { %p560_p3 = por %p559_p13, %p558_p5 }
  0x8e   : > { %p556_p2 = pneg %p555_p6 }
  0x8f   : > { %p562_p11 = por %p561_p8, %p560_p3 }
  0x91   : > { %p563_p4 = pnand %p562_p11, %p556_p2 }
  0x93   : > { %566 = shalt.err (!%p563_p4)
}
  0x94   : > { %404 = dma.vmem_to_hbm [thread:$0]  (%p880_p0), %s814_s26, 128, %s819_s29, %s263_s3  }
  0x95 PF: > { %s289_s15 = sand.u32 1, %s605_s9   ;;  %p881_p7 = scmp.ne.s32.totalorder %s874_s24, 0 }
  0x96   : > { %p882_p10 = scmp.ge.s32.totalorder %s625_s14, 2  ;;  %s290_s19 = scalar_lea.sflag [#allocation4], %s289_s15 }
  0x98   : > { %p414_p12 = pnand %p882_p10, %p881_p7 }
  0x9a   : > { %600 = dma.done.wait (!%p414_p12), %s290_s19, 128  }
  0x9b   : > { %602 = vsyncadd (!%p414_p12), %s290_s19, 4294967168  ;;  %s21_s14 = sadd.s32 1, %s625_s14   ;;  %s883_s9 = smov %s609_s10 }
  0x9c   : > { %p18_p9 = scmp.ge.s32.totalorder %s21_s14, 4   ;;  %s884_s10 = smov %s613_s11 }
  0x9d   : > { %s885_s11 = smov %s703_s23  ;;  %s886_s12 = smov %s621_s13 }
  0x9e   : > { %s887_s13 = smov %s889_s17  ;;  %20 = sbr.rel (!%p18_p9) target bundleno = 8 (0x8), region = 86 }
  0xa5   :  { %295 = vsyncpa [#allocation3], 1 }
  0xa6   :  { %297 = vsyncpa [#allocation3 + $0x1], 1 }
  0xa7   :  { %298 = vsyncpa [#allocation6], 1 }
  0xa8   :  { %300 = vsyncpa [#allocation6 + $0x1], 1 }
  0xa9   :  { %301 = vsyncpa [#allocation4], 1 }
  0xaa   :  { %303 = vsyncpa [#allocation4 + $0x1], 1 }

</bundles_post_ra>
